<compile_context>
chip_gen: v6e
topology: v6e:2x2x1
jax: 0.10.0
libtpu: 0.0.40
codegen_flags: <defaults>
</compile_context>

<pallas_src>
import functools

import jax
import jax.numpy as jnp
from jax import lax
from jax.experimental import pallas as pl
from jax.experimental.pallas import tpu as pltpu

D_IN = 1024
D_HID = 256
D_OUT = 3
BN_EPS = 1e-5
LEAKY_SLOPE = 0.01

MAX_TILE_B = 2048          # batch tile for the tiled (grid) paths
FUSE_MAX_B = 1024          # BN path: fully fused single kernel when B fits
STAT_ROWS = 8              # sublane-aligned rows for per-tile partial stats
VMEM_LIMIT = 40 * 1024 * 1024


def _round_up(x, m):
    return (x + m - 1) // m * m


def _leaky_relu(h):
    return jnp.maximum(h, LEAKY_SLOPE * h)


# ----------------------------- use_bn=False path -----------------------------
def _nobn_kernel(x_ref, w1_ref, b1_ref, w2_ref, b2_ref, o_ref):
    # f32 x tile is cast to bf16 in-register; MXU accumulates in f32.
    h = jnp.dot(x_ref[...].astype(jnp.bfloat16), w1_ref[...],
                preferred_element_type=jnp.float32) + b1_ref[...]
    h = _leaky_relu(h)
    o_ref[...] = jnp.dot(h.astype(jnp.bfloat16), w2_ref[...],
                         preferred_element_type=jnp.float32) + b2_ref[...]


# -------------------- use_bn=True, fused path (B <= 1024) --------------------
def _bn_fused_kernel(x_ref, w1_ref, gamma_ref, beta_ref, w2_ref, b2_ref, o_ref):
    # NOTE: b1 is intentionally omitted on the BN path: BatchNorm's mean
    # subtraction cancels the Linear bias exactly.  Do not re-add it here.
    h = jnp.dot(x_ref[...].astype(jnp.bfloat16), w1_ref[...],
                preferred_element_type=jnp.float32)
    mean = jnp.mean(h, axis=0, keepdims=True)
    centered = h - mean
    var = jnp.mean(centered * centered, axis=0, keepdims=True)   # two-pass, safe
    scale = gamma_ref[...] * lax.rsqrt(var + BN_EPS)
    shift = beta_ref[...] - mean * scale
    hn = _leaky_relu(h * scale + shift)                           # fused BN FMA
    o_ref[...] = jnp.dot(hn.astype(jnp.bfloat16), w2_ref[...],
                         preferred_element_type=jnp.float32) + b2_ref[...]


# ----------------- use_bn=True, tiled path, pass 1 (mm1+stats) ----------------
def _mm1_stats_kernel(x_ref, w1_ref, h_ref, sum_ref, sumsq_ref):
    # b1 omitted (see note above).  This also keeps zero-padded batch rows out
    # of the statistics: they contribute exactly 0 to sum / sumsq.
    h = jnp.dot(x_ref[...].astype(jnp.bfloat16), w1_ref[...],
                preferred_element_type=jnp.float32)
    h_ref[...] = h.astype(jnp.bfloat16)          # bf16 round trip halves h traffic
    s = jnp.sum(h, axis=0, keepdims=True)        # per-tile partials, f32
    ssq = jnp.sum(h * h, axis=0, keepdims=True)
    rows = lax.broadcasted_iota(jnp.int32, (STAT_ROWS, D_HID), 0)
    row0 = rows == 0                             # stats live in row 0 of the block
    sum_ref[...] = jnp.where(row0, s, 0.0)
    sumsq_ref[...] = jnp.where(row0, ssq, 0.0)


# ------------- use_bn=True, tiled path, pass 2 (BN + act + mm2) --------------
def _bn_act_mm2_kernel(h_ref, sum_ref, sumsq_ref, gamma_ref, beta_ref,
                       w2_ref, b2_ref, o_ref, *, inv_b):
    mean = sum_ref[...] * inv_b
    var = sumsq_ref[...] * inv_b - mean * mean   # one-pass (global) variance
    var = jnp.maximum(var, 0.0)                  # guard f32 cancellation
    scale = gamma_ref[...] * lax.rsqrt(var + BN_EPS)
    shift = beta_ref[...] - mean * scale
    h = h_ref[...].astype(jnp.float32) * scale + shift
    h = _leaky_relu(h)
    o_ref[...] = jnp.dot(h.astype(jnp.bfloat16), w2_ref[...],
                         preferred_element_type=jnp.float32) + b2_ref[...]


def center_prediction_head(x, params, *, use_bn):
    """x: (B, 1024) float32 -> (B, 3) float32."""
    B = x.shape[0]
    assert x.shape[1] == D_IN
    x = x.astype(jnp.float32)

    # Small one-time weight casts (bf16 MXU operands); biases stay f32.
    w1 = params["w1"].astype(jnp.bfloat16)
    w2 = params["w2"].astype(jnp.bfloat16)
    b2 = params["b2"].astype(jnp.float32)

    def cparams(sem):
        return pltpu.CompilerParams(dimension_semantics=sem,
                                    vmem_limit_bytes=VMEM_LIMIT)

    const = lambda shape: pl.BlockSpec(shape, lambda i: (0,) * len(shape))
    row_tile = lambda shape: pl.BlockSpec(
        shape, lambda i: (i,) + (0,) * (len(shape) - 1))

    # ------------- BN path, whole batch fits: single fused kernel -------------
    if use_bn and B <= FUSE_MAX_B:
        out = pl.pallas_call(
            _bn_fused_kernel,
            out_shape=jax.ShapeDtypeStruct((B, D_OUT), jnp.float32),
            grid_spec=pltpu.PrefetchScalarGridSpec(
                num_scalar_prefetch=0,
                grid=(1,),
                in_specs=[const((B, D_IN)),          # x (no pad, no wrapper cast)
                          const((D_IN, D_HID)),      # w1
                          const((1, D_HID)),         # gamma
                          const((1, D_HID)),         # beta
                          const((D_HID, D_OUT)),     # w2 (narrow)
                          const((1, D_OUT))],        # b2 (narrow)
                out_specs=const((B, D_OUT))),
            compiler_params=cparams(("arbitrary",)),
        )(x, w1, params["gamma"], params["beta"], w2, b2)
        return out

    # ------------------------------ tiled paths -------------------------------
    tile_b = min(MAX_TILE_B, _round_up(B, 16))       # multiple of 16 (>= STAT_ROWS)
    b_pad = _round_up(B, tile_b)
    nb = b_pad // tile_b
    x_p = x if b_pad == B else jnp.pad(x, ((0, b_pad - B), (0, 0)))

    if not use_bn:
        out = pl.pallas_call(
            _nobn_kernel,
            out_shape=jax.ShapeDtypeStruct((b_pad, D_OUT), jnp.float32),
            grid_spec=pltpu.PrefetchScalarGridSpec(
                num_scalar_prefetch=0,
                grid=(nb,),
                in_specs=[row_tile((tile_b, D_IN)),   # x tile (revolving)
                          const((D_IN, D_HID)),       # w1 (VMEM-resident)
                          const((1, D_HID)),          # b1
                          const((D_HID, D_OUT)),      # w2
                          const((1, D_OUT))],         # b2
                out_specs=row_tile((tile_b, D_OUT))),
            compiler_params=cparams(("parallel",)),
        )(x_p, w1, params["b1"], w2, b2)
        return out[:B]

    # --- BN pass 1: h = x @ w1 (bf16 out) + independent per-tile partial stats ---
    h, psum, psumsq = pl.pallas_call(
        _mm1_stats_kernel,
        out_shape=(jax.ShapeDtypeStruct((b_pad, D_HID), jnp.bfloat16),
                   jax.ShapeDtypeStruct((nb * STAT_ROWS, D_HID), jnp.float32),
                   jax.ShapeDtypeStruct((nb * STAT_ROWS, D_HID), jnp.float32)),
        grid_spec=pltpu.PrefetchScalarGridSpec(
            num_scalar_prefetch=0,
            grid=(nb,),
            in_specs=[row_tile((tile_b, D_IN)),       # x tile
                      const((D_IN, D_HID))],          # w1 (VMEM-resident)
            out_specs=(row_tile((tile_b, D_HID)),     # h tile (bf16)
                       row_tile((STAT_ROWS, D_HID)),  # per-tile sum partials
                       row_tile((STAT_ROWS, D_HID)))),# per-tile sumsq partials
        compiler_params=cparams(("parallel",)),       # megacore-friendly on v7x
    )(x_p, w1)

    # Tiny XLA reduction of the nb partial rows -> global batch statistics.
    h_sum = jnp.sum(psum, axis=0, keepdims=True)
    h_sumsq = jnp.sum(psumsq, axis=0, keepdims=True)

    # --- BN pass 2: normalize with global stats + LeakyReLU + matmul-2 ---
    kernel2 = functools.partial(_bn_act_mm2_kernel, inv_b=1.0 / B)
    out = pl.pallas_call(
        kernel2,
        out_shape=jax.ShapeDtypeStruct((b_pad, D_OUT), jnp.float32),
        grid_spec=pltpu.PrefetchScalarGridSpec(
            num_scalar_prefetch=0,
            grid=(nb,),
            in_specs=[row_tile((tile_b, D_HID)),      # h tile (bf16)
                      const((1, D_HID)),              # sum
                      const((1, D_HID)),              # sumsq
                      const((1, D_HID)),              # gamma
                      const((1, D_HID)),              # beta
                      const((D_HID, D_OUT)),          # w2
                      const((1, D_OUT))],             # b2
            out_specs=row_tile((tile_b, D_OUT))),
        compiler_params=cparams(("parallel",)),
    )(h, h_sum, h_sumsq, params["gamma"], params["beta"], w2, b2)
    return out[:B]


def init_params(key, use_bn):
    """Deterministic synthetic parameters matching the PyTorch module shapes."""
    k1, k2, k3, k4 = jax.random.split(key, 4)
    params = {
        # Linear(1024, 256): torch weight (256,1024); stored transposed.
        "w1": jax.random.normal(k1, (D_IN, D_HID), jnp.float32) * (1.0 / jnp.sqrt(D_IN)),
        "b1": jax.random.normal(k2, (1, D_HID), jnp.float32) * 0.01,
        # Linear(256, 3): torch weight (3,256); stored transposed.
        "w2": jax.random.normal(k3, (D_HID, D_OUT), jnp.float32) * (1.0 / jnp.sqrt(D_HID)),
        "b2": jax.random.normal(k4, (1, D_OUT), jnp.float32) * 0.01,
    }
    if use_bn:
        params["gamma"] = jnp.ones((1, D_HID), jnp.float32)
        params["beta"] = jnp.zeros((1, D_HID), jnp.float32)
    return params


def _reference(x, params, use_bn):
    """Pure-f32 reference matching torch forward (BN in training mode)."""
    h = x @ params["w1"] + params["b1"]
    if use_bn:
        mean = jnp.mean(h, axis=0, keepdims=True)
        var = jnp.mean((h - mean) ** 2, axis=0, keepdims=True)
        h = (h - mean) / jnp.sqrt(var + BN_EPS) * params["gamma"] + params["beta"]
    h = jnp.where(h >= 0, h, LEAKY_SLOPE * h)
    return h @ params["w2"] + params["b2"]


if __name__ == "__main__":
    key = jax.random.PRNGKey(0)
    kx1, kx2, kp = jax.random.split(key, 3)

    ok = True
    # B=16 exercises the fused BN kernel and the single-tile no-BN kernel;
    # B=2100 exercises the tiled (nb=2, padded) BN two-pass path.
    for B, kx in ((16, kx1), (2100, kx2)):
        x = jax.random.normal(kx, (B, D_IN), jnp.float32)
        for use_bn in (True, False):
            params = init_params(kp, use_bn)
            y = jax.block_until_ready(
                center_prediction_head(x, params, use_bn=use_bn))
            y_ref = _reference(x, params, use_bn)
            if y.shape != (B, D_OUT):
                ok = False
            # bf16 MXU operands (f32 accumulate) -> loosened tolerance vs f32 ref.
            if not jnp.allclose(y, y_ref, atol=5e-2, rtol=5e-2):
                ok = False

    if ok:
        print("KERNEL_OK")
</pallas_src>

<mosaic_0001>
module attributes {stable_mosaic.version = 11 : i64} {
  func.func @_bn_fused_kernel(%arg0: i32, %arg1: memref<16x1024xf32, #tpu.memory_space<vmem>>, %arg2: memref<1024x256xbf16, #tpu.memory_space<vmem>>, %arg3: memref<1x256xf32, #tpu.memory_space<vmem>>, %arg4: memref<1x256xf32, #tpu.memory_space<vmem>>, %arg5: memref<256x3xbf16, #tpu.memory_space<vmem>>, %arg6: memref<1x3xf32, #tpu.memory_space<vmem>>, %arg7: memref<16x3xf32, #tpu.memory_space<vmem>>) attributes {dimension_semantics = [#tpu.dimension_semantics<arbitrary>], iteration_bounds = array<i64: 1>, scalar_prefetch = 0 : i64, scratch_operands = 0 : i64, tpu.core_type = #tpu.core_type<tc>, window_params = [{pipeline_mode = #tpu.pipeline_mode<synchronous>, transform_indices = @transform_0, window_bounds = array<i64: 16, 1024>}, {pipeline_mode = #tpu.pipeline_mode<synchronous>, transform_indices = @transform_1, window_bounds = array<i64: 1024, 256>}, {pipeline_mode = #tpu.pipeline_mode<synchronous>, transform_indices = @transform_2, window_bounds = array<i64: 1, 256>}, {pipeline_mode = #tpu.pipeline_mode<synchronous>, transform_indices = @transform_3, window_bounds = array<i64: 1, 256>}, {pipeline_mode = #tpu.pipeline_mode<synchronous>, transform_indices = @transform_4, window_bounds = array<i64: 256, 3>}, {pipeline_mode = #tpu.pipeline_mode<synchronous>, transform_indices = @transform_5, window_bounds = array<i64: 1, 3>}, {pipeline_mode = #tpu.pipeline_mode<synchronous>, transform_indices = @transform_6, window_bounds = array<i64: 16, 3>}]} {
    %c0 = arith.constant 0 : index
    %c0_0 = arith.constant 0 : index
    %0 = vector.load %arg1[%c0, %c0_0] : memref<16x1024xf32, #tpu.memory_space<vmem>>, vector<16x1024xf32>
    %1 = arith.truncf %0 : vector<16x1024xf32> to vector<16x1024xbf16>
    %c0_1 = arith.constant 0 : index
    %c0_2 = arith.constant 0 : index
    %2 = vector.load %arg2[%c0_1, %c0_2] : memref<1024x256xbf16, #tpu.memory_space<vmem>>, vector<1024x256xbf16>
    %cst = arith.constant dense<0.000000e+00> : vector<16x256xf32>
    %3 = tpu.matmul %1, %2, %cst {dimension_numbers = #tpu.dot_dimension_numbers<[1], [0], [0], [1], [0, 0, 1, 1], [], []>} : vector<16x1024xbf16>, vector<1024x256xbf16>, vector<16x256xf32> -> vector<16x256xf32>
    %cst_3 = arith.constant dense<0.000000e+00> : vector<256xf32>
    %4 = vector.multi_reduction <add>, %3, %cst_3 [0] : vector<16x256xf32> to vector<256xf32>
    %5 = vector.shape_cast %4 : vector<256xf32> to vector<1x256xf32>
    %cst_4 = arith.constant 1.600000e+01 : f32
    %6 = vector.broadcast %cst_4 : f32 to vector<1x256xf32>
    %7 = arith.divf %5, %6 : vector<1x256xf32>
    %8 = vector.broadcast %7 : vector<1x256xf32> to vector<16x256xf32>
    %9 = arith.subf %3, %8 : vector<16x256xf32>
    %10 = arith.mulf %9, %9 : vector<16x256xf32>
    %cst_5 = arith.constant dense<0.000000e+00> : vector<256xf32>
    %11 = vector.multi_reduction <add>, %10, %cst_5 [0] : vector<16x256xf32> to vector<256xf32>
    %12 = vector.shape_cast %11 : vector<256xf32> to vector<1x256xf32>
    %cst_6 = arith.constant 1.600000e+01 : f32
    %13 = vector.broadcast %cst_6 : f32 to vector<1x256xf32>
    %14 = arith.divf %12, %13 : vector<1x256xf32>
    %c0_7 = arith.constant 0 : index
    %c0_8 = arith.constant 0 : index
    %15 = vector.load %arg3[%c0_7, %c0_8] : memref<1x256xf32, #tpu.memory_space<vmem>>, vector<1x256xf32>
    %cst_9 = arith.constant 9.99999974E-6 : f32
    %16 = vector.broadcast %cst_9 : f32 to vector<1x256xf32>
    %17 = arith.addf %14, %16 : vector<1x256xf32>
    %18 = math.rsqrt %17 : vector<1x256xf32>
    %19 = arith.mulf %15, %18 : vector<1x256xf32>
    %c0_10 = arith.constant 0 : index
    %c0_11 = arith.constant 0 : index
    %20 = vector.load %arg4[%c0_10, %c0_11] : memref<1x256xf32, #tpu.memory_space<vmem>>, vector<1x256xf32>
    %21 = arith.mulf %7, %19 : vector<1x256xf32>
    %22 = arith.subf %20, %21 : vector<1x256xf32>
    %23 = vector.broadcast %19 : vector<1x256xf32> to vector<16x256xf32>
    %24 = arith.mulf %3, %23 : vector<16x256xf32>
    %25 = vector.broadcast %22 : vector<1x256xf32> to vector<16x256xf32>
    %26 = arith.addf %24, %25 : vector<16x256xf32>
    %cst_12 = arith.constant 0.00999999977 : f32
    %27 = vector.broadcast %cst_12 : f32 to vector<16x256xf32>
    %28 = arith.mulf %27, %26 : vector<16x256xf32>
    %29 = arith.maximumf %26, %28 : vector<16x256xf32>
    %30 = arith.truncf %29 : vector<16x256xf32> to vector<16x256xbf16>
    %c0_13 = arith.constant 0 : index
    %c0_14 = arith.constant 0 : index
    %31 = vector.load %arg5[%c0_13, %c0_14] : memref<256x3xbf16, #tpu.memory_space<vmem>>, vector<256x3xbf16>
    %cst_15 = arith.constant dense<0.000000e+00> : vector<16x3xf32>
    %32 = tpu.matmul %30, %31, %cst_15 {dimension_numbers = #tpu.dot_dimension_numbers<[1], [0], [0], [1], [0, 0, 1, 1], [], []>} : vector<16x256xbf16>, vector<256x3xbf16>, vector<16x3xf32> -> vector<16x3xf32>
    %c0_16 = arith.constant 0 : index
    %c0_17 = arith.constant 0 : index
    %33 = vector.load %arg6[%c0_16, %c0_17] : memref<1x3xf32, #tpu.memory_space<vmem>>, vector<1x3xf32>
    %34 = vector.broadcast %33 : vector<1x3xf32> to vector<16x3xf32>
    %35 = arith.addf %32, %34 : vector<16x3xf32>
    %c0_18 = arith.constant 0 : index
    %c0_19 = arith.constant 0 : index
    %36 = vector.load %arg7[%c0_18, %c0_19] : memref<16x3xf32, #tpu.memory_space<vmem>>, vector<16x3xf32>
    tpu.vector_store %arg7[%c0_18, %c0_19], %35 {strides = array<i32>} : memref<16x3xf32, #tpu.memory_space<vmem>>, vector<16x3xf32>,
    return
  }
  func.func @transform_0(%arg0: i32) -> (i32, i32) {
    %c0_i32 = arith.constant 0 : i32
    %c0_i32_0 = arith.constant 0 : i32
    %c0_i32_1 = arith.constant 0 : i32
    return %c0_i32, %c0_i32_0 : i32, i32
  }
  func.func @transform_1(%arg0: i32) -> (i32, i32) {
    %c0_i32 = arith.constant 0 : i32
    %c0_i32_0 = arith.constant 0 : i32
    %c0_i32_1 = arith.constant 0 : i32
    return %c0_i32, %c0_i32_0 : i32, i32
  }
  func.func @transform_2(%arg0: i32) -> (i32, i32) {
    %c0_i32 = arith.constant 0 : i32
    %c0_i32_0 = arith.constant 0 : i32
    %c0_i32_1 = arith.constant 0 : i32
    return %c0_i32, %c0_i32_0 : i32, i32
  }
  func.func @transform_3(%arg0: i32) -> (i32, i32) {
    %c0_i32 = arith.constant 0 : i32
    %c0_i32_0 = arith.constant 0 : i32
    %c0_i32_1 = arith.constant 0 : i32
    return %c0_i32, %c0_i32_0 : i32, i32
  }
  func.func @transform_4(%arg0: i32) -> (i32, i32) {
    %c0_i32 = arith.constant 0 : i32
    %c0_i32_0 = arith.constant 0 : i32
    %c0_i32_1 = arith.constant 0 : i32
    return %c0_i32, %c0_i32_0 : i32, i32
  }
  func.func @transform_5(%arg0: i32) -> (i32, i32) {
    %c0_i32 = arith.constant 0 : i32
    %c0_i32_0 = arith.constant 0 : i32
    %c0_i32_1 = arith.constant 0 : i32
    return %c0_i32, %c0_i32_0 : i32, i32
  }
  func.func @transform_6(%arg0: i32) -> (i32, i32) {
    %c0_i32 = arith.constant 0 : i32
    %c0_i32_0 = arith.constant 0 : i32
    %c0_i32_1 = arith.constant 0 : i32
    return %c0_i32, %c0_i32_0 : i32, i32
  }
}

</mosaic_0001>

<bundles_post_ra>
// kernel: tpu_custom_call.1
= control target key start
LH: loop header
LB: loop body
LE: loop exit
PB: predicated region body
PF: predicated region fallthrough
CT: control target
= control target key end

     0   :  { %11 = vsyncpa [#allocation3], 0  ;;  %s1718_s21 = smov [#allocation2]   ;;  %s1891_s0 = inlined_call_operand.vmem [shape: f32[16,1024], index: 0, kind: input, shape index: {}]   ;;  %s1892_s1 = inlined_call_operand.hbm [shape: bf16[1024,256], index: 1, kind: input, shape index: {}]   ;;  %s1893_s2 = inlined_call_operand.vmem [shape: f32[1,256], index: 2, kind: input, shape index: {}]   ;;  %s1894_s3 = inlined_call_operand.vmem [shape: f32[1,256], index: 3, kind: input, shape index: {}]   ;;  %s1895_s4 = inlined_call_operand.vmem [shape: bf16[256,3], index: 4, kind: input, shape index: {}]   ;;  %s1896_s5 = inlined_call_operand.vmem [shape: f32[1,3], index: 5, kind: input, shape index: {}]   ;;  %s1897_s6 = inlined_call_operand.vmem [shape: f32[16,3], index: 6, kind: output, shape index: {}]  }
   0x1   :  { %s19_s22 = sshll.u32 %s1718_s21, 4  ;;  %s20_s22 = int_to_ptr.vmem [resolvable:$true] %s19_s22 }
   0x2   :  { %s1704_s23 = scalar_lea.vmem %s20_s22, 16384  ;;  %p1709_p1 = scmp.lt.s32.totalorder %s20_s22, %s20_s22 }
   0x3   :  { %p1705_p0 = scmp.ne.s32.totalorder %s20_s22, %s1704_s23  ;;  %p1710_p2 = scmp.lt.s32.totalorder %s1704_s23, %s1704_s23 }
   0x5   :  { %p1711_p3 = por %p1710_p2, %p1709_p1 }
   0x7   :  { %p1712_p4 = pnand %p1711_p3, %p1705_p0 }
   0x9   :  { %1715 = shalt.err (!%p1712_p4)
}
   0xa   :  { %s1719_s24 = smov 128   ;;  %s1720_s25 = smov 8  }
   0xb   :  { %25 = dma.hbm_to_vmem [thread:$0]  %s1892_s1, 16384, %s20_s22, [#allocation3], %s1719_s24, %s1719_s24, %s1720_s25  }
   0xc   :  { %1716 = dma.done.wait [#allocation3], 16384  }
   0xd   :  { %1717 = vsyncadd [#allocation3], 4294950912  ;;  %v1484_v0 = vld [vmem:[#allocation2 + $0x74] ss:$8 sps:$4 sm:$0xff]   ;;  %v1488_v2 = vld [vmem:[#allocation2 + $0x70] ss:$8 sps:$4 sm:$0xff]  }
   0xe   :  { %v1486_v1 = vld [vmem:[#allocation2 + $0x174] ss:$8 sps:$4 sm:$0xff]   ;;  %830 = vmatprep.subr.bf16.mxu0 %v1484_v0  ;;  %v1489_v3 = vld [vmem:[#allocation2 + $0x170] ss:$8 sps:$4 sm:$0xff]   ;;  %v1490_v4 = vld [vmem:[#allocation2 + $0x64] ss:$8 sps:$4 sm:$0xff]  }
   0xf   :  { %873 = vmatprep.subr.bf16.mxu1 %v1486_v1  ;;  %831 = vmatpush1.bf16.msra.mxu0 %v1488_v2  ;;  %v1492_v5 = vld [vmem:[#allocation2 + $0x164] ss:$8 sps:$4 sm:$0xff]   ;;  %v1494_v6 = vld [vmem:[#allocation2 + $0x60] ss:$8 sps:$4 sm:$0xff]   ;;  %v1496_v8 = vld [vmem:[#allocation2 + $0x54] ss:$8 sps:$4 sm:$0xff]  }
  0x10   :  { %874 = vmatpush1.bf16.msra.mxu1 %v1489_v3  ;;  %832 = vmatprep.subr.bf16.mxu0 %v1490_v4  ;;  %v1495_v7 = vld [vmem:[#allocation2 + $0x160] ss:$8 sps:$4 sm:$0xff]   ;;  %v1498_v9 = vld [vmem:[#allocation2 + $0x154] ss:$8 sps:$4 sm:$0xff]   ;;  %v1500_v10 = vld [vmem:[#allocation2 + $0x50] ss:$8 sps:$4 sm:$0xff]  }
  0x11   :  { %875 = vmatprep.subr.bf16.mxu1 %v1492_v5  ;;  %v1501_v11 = vld [vmem:[#allocation2 + $0x150] ss:$8 sps:$4 sm:$0xff]   ;;  %v1502_v12 = vld [vmem:[#allocation2 + $0x44] ss:$8 sps:$4 sm:$0xff]   ;;  %v1506_v14 = vld [vmem:[#allocation2 + $0x40] ss:$8 sps:$4 sm:$0xff]  }
  0x12   :  { %v1504_v13 = vld [vmem:[#allocation2 + $0x144] ss:$8 sps:$4 sm:$0xff]   ;;  %v1507_v15 = vld [vmem:[#allocation2 + $0x140] ss:$8 sps:$4 sm:$0xff]   ;;  %v1508_v16 = vld [vmem:[#allocation2 + $0x34] ss:$8 sps:$4 sm:$0xff]  }
  0x13   :  { %833 = vmatpush1.bf16.msra.mxu0 %v1494_v6  ;;  %v1510_v17 = vld [vmem:[#allocation2 + $0x134] ss:$8 sps:$4 sm:$0xff]   ;;  %v1512_v18 = vld [vmem:[#allocation2 + $0x30] ss:$8 sps:$4 sm:$0xff]   ;;  %v1514_v20 = vld [vmem:[#allocation2 + $0x24] ss:$8 sps:$4 sm:$0xff]  }
  0x14   :  { %876 = vmatpush1.bf16.msra.mxu1 %v1495_v7  ;;  %834 = vmatprep.subr.bf16.mxu0 %v1496_v8  ;;  %v1513_v19 = vld [vmem:[#allocation2 + $0x130] ss:$8 sps:$4 sm:$0xff]   ;;  %v1516_v21 = vld [vmem:[#allocation2 + $0x124] ss:$8 sps:$4 sm:$0xff]   ;;  %v1518_v22 = vld [vmem:[#allocation2 + $0x20] ss:$8 sps:$4 sm:$0xff]  }
  0x15   :  { %877 = vmatprep.subr.bf16.mxu1 %v1498_v9  ;;  %v1519_v23 = vld [vmem:[#allocation2 + $0x120] ss:$8 sps:$4 sm:$0xff]   ;;  %v1520_v24 = vld [vmem:[#allocation2 + $0x14] ss:$8 sps:$4 sm:$0xff]   ;;  %v1524_v26 = vld [vmem:[#allocation2 + $0x10] ss:$8 sps:$4 sm:$0xff]  }
  0x16   :  { %v1522_v25 = vld [vmem:[#allocation2 + $0x114] ss:$8 sps:$4 sm:$0xff]   ;;  %v1525_v27 = vld [vmem:[#allocation2 + $0x110] ss:$8 sps:$4 sm:$0xff]   ;;  %v1526_v28 = vld [vmem:[#allocation2 + $0x4] ss:$8 sps:$4 sm:$0xff]  }
  0x17   :  { %835 = vmatpush1.bf16.msra.mxu0 %v1500_v10  ;;  %v1528_v29 = vld [vmem:[#allocation2 + $0x104] ss:$8 sps:$4 sm:$0xff]   ;;  %v1530_v30 = vld [vmem:[#allocation2] ss:$8 sps:$4 sm:$0xff]   ;;  %v1532_v32 = vld [vmem:[#allocation2 + $0xf4] ss:$8 sps:$4 sm:$0xff]  }
  0x18   :  { %878 = vmatpush1.bf16.msra.mxu1 %v1501_v11  ;;  %836 = vmatprep.subr.bf16.mxu0 %v1502_v12  ;;  %v1531_v31 = vld [vmem:[#allocation2 + $0x100] ss:$8 sps:$4 sm:$0xff]   ;;  %v1534_v33 = vld [vmem:[#allocation2 + $0x1f4] ss:$8 sps:$4 sm:$0xff]   ;;  %v1536_v34 = vld [vmem:[#allocation2 + $0xf0] ss:$8 sps:$4 sm:$0xff]  }
  0x19   :  { %879 = vmatprep.subr.bf16.mxu1 %v1504_v13  ;;  %v1537_v35 = vld [vmem:[#allocation2 + $0x1f0] ss:$8 sps:$4 sm:$0xff]   ;;  %v1538_v36 = vld [vmem:[#allocation2 + $0xe4] ss:$8 sps:$4 sm:$0xff]   ;;  %v1542_v38 = vld [vmem:[#allocation2 + $0xe0] ss:$8 sps:$4 sm:$0xff]  }
  0x1a   :  { %v1540_v37 = vld [vmem:[#allocation2 + $0x1e4] ss:$8 sps:$4 sm:$0xff]   ;;  %v1543_v39 = vld [vmem:[#allocation2 + $0x1e0] ss:$8 sps:$4 sm:$0xff]   ;;  %v1544_v40 = vld [vmem:[#allocation2 + $0xd4] ss:$8 sps:$4 sm:$0xff]  }
  0x1b   :  { %837 = vmatpush1.bf16.msra.mxu0 %v1506_v14  ;;  %v1546_v41 = vld [vmem:[#allocation2 + $0x1d4] ss:$8 sps:$4 sm:$0xff]   ;;  %v1548_v42 = vld [vmem:[#allocation2 + $0xd0] ss:$8 sps:$4 sm:$0xff]   ;;  %v1550_v44 = vld [vmem:[#allocation2 + $0xc4] ss:$8 sps:$4 sm:$0xff]  }
  0x1c   :  { %880 = vmatpush1.bf16.msra.mxu1 %v1507_v15  ;;  %838 = vmatprep.subr.bf16.mxu0 %v1508_v16  ;;  %v1549_v43 = vld [vmem:[#allocation2 + $0x1d0] ss:$8 sps:$4 sm:$0xff]   ;;  %v1552_v45 = vld [vmem:[#allocation2 + $0x1c4] ss:$8 sps:$4 sm:$0xff]   ;;  %v1554_v50 = vld [vmem:[#allocation2 + $0xc0] ss:$8 sps:$4 sm:$0xff]  }
  0x1d   :  { %881 = vmatprep.subr.bf16.mxu1 %v1510_v17  ;;  %v39_v46 = vld [vmem:[%s1891_s0 + $0x8] sm:$0xff]  ;;  %v41_v48 = vld [vmem:[%s1891_s0 + $0x18] sm:$0xff]  ;;  %v38_v6 = vld [vmem:[%s1891_s0] sm:$0xff]  ;;  %vm1305_vm0 = vcmask 23552  }
  0x1e   :  { %v47_v47 = vld [vmem:[%s1891_s0 + $0x48] sm:$0xff]  ;;  %v49_v49 = vld [vmem:[%s1891_s0 + $0x58] sm:$0xff]  ;;  %v46_v7 = vld [vmem:[%s1891_s0 + $0x40] sm:$0xff] }
  0x1f   :  { %839 = vmatpush1.bf16.msra.mxu0 %v1512_v18  ;;  %v1555_v51 = vld [vmem:[#allocation2 + $0x1c0] ss:$8 sps:$4 sm:$0xff]   ;;  %v1556_v52 = vld [vmem:[#allocation2 + $0xb4] ss:$8 sps:$4 sm:$0xff]   ;;  %v55_v53 = vpack.c.bf16 %v47_v47, %v39_v46  ;;  %v57_v54 = vpack.c.bf16 %v49_v49, %v41_v48  ;;  %v1560_v56 = vld [vmem:[#allocation2 + $0xb0] ss:$8 sps:$4 sm:$0xff]   ;;  %v54_v12 = vpack.c.bf16 %v46_v7, %v38_v6 }
  0x20   :  { %882 = vmatpush1.bf16.msra.mxu1 %v1513_v19  ;;  %840 = vmatprep.subr.bf16.mxu0 %v1514_v20  ;;  %v1558_v55 = vld [vmem:[#allocation2 + $0x1b4] ss:$8 sps:$4 sm:$0xff]   ;;  %v1561_v57 = vld [vmem:[#allocation2 + $0x1b0] ss:$8 sps:$4 sm:$0xff]   ;;  %v1562_v58 = vld [vmem:[#allocation2 + $0xa4] ss:$8 sps:$4 sm:$0xff]  }
  0x21   :  { %883 = vmatprep.subr.bf16.mxu1 %v1516_v21  ;;  %862 = vmatprep.mubr.bf16.mxu0 %v55_v53  ;;  %v1564_v59 = vld [vmem:[#allocation2 + $0x1a4] ss:$8 sps:$4 sm:$0xff]   ;;  %v1566_v60 = vld [vmem:[#allocation2 + $0xa0] ss:$8 sps:$4 sm:$0xff]   ;;  %v1568_v62 = vld [vmem:[#allocation2 + $0x94] ss:$8 sps:$4 sm:$0xff]  }
  0x22   :  { %905 = vmatprep.mubr.bf16.mxu1 %v57_v54  ;;  %v1567_v61 = vld [vmem:[#allocation2 + $0x1a0] ss:$8 sps:$4 sm:$0xff]   ;;  %v1570_v63 = vld [vmem:[#allocation2 + $0x194] ss:$8 sps:$4 sm:$0xff]   ;;  %v1572_v0 = vld [vmem:[#allocation2 + $0x90] ss:$8 sps:$4 sm:$0xff]  }
  0x23   :  { %841 = vmatpush1.bf16.msra.mxu0 %v1518_v22  ;;  %v1573_v1 = vld [vmem:[#allocation2 + $0x190] ss:$8 sps:$4 sm:$0xff]   ;;  %v1574_v2 = vld [vmem:[#allocation2 + $0x84] ss:$8 sps:$4 sm:$0xff]   ;;  %v1578_v4 = vld [vmem:[#allocation2 + $0x80] ss:$8 sps:$4 sm:$0xff]  }
  0x24   :  { %884 = vmatpush1.bf16.msra.mxu1 %v1519_v23  ;;  %842 = vmatprep.subr.bf16.mxu0 %v1520_v24  ;;  %v1576_v3 = vld [vmem:[#allocation2 + $0x184] ss:$8 sps:$4 sm:$0xff]   ;;  %v1579_v5 = vld [vmem:[#allocation2 + $0x180] ss:$8 sps:$4 sm:$0xff]   ;;  %v40_v8 = vld [vmem:[%s1891_s0 + $0x10] sm:$0xff] }
  0x25   :  { %885 = vmatprep.subr.bf16.mxu1 %v1522_v25  ;;  %v48_v9 = vld [vmem:[%s1891_s0 + $0x50] sm:$0xff]  ;;  %v1588_v16 = vld [vmem:[#allocation2 + $0x264] ss:$8 sps:$4 sm:$0xff]   ;;  %v1586_v18 = vld [vmem:[#allocation2 + $0x260] ss:$8 sps:$4 sm:$0xff]  }
  0x26   :  { %v1582_v10 = vld [vmem:[#allocation2 + $0x274] ss:$8 sps:$4 sm:$0xff]   ;;  %v56_v13 = vpack.c.bf16 %v48_v9, %v40_v8  ;;  %v1580_v14 = vld [vmem:[#allocation2 + $0x270] ss:$8 sps:$4 sm:$0xff]   ;;  %v1591_v17 = vld [vmem:[#allocation2 + $0x364] ss:$8 sps:$4 sm:$0xff]  }
  0x27   :  { %843 = vmatpush1.bf16.msra.mxu0 %v1524_v26  ;;  %v1585_v11 = vld [vmem:[#allocation2 + $0x374] ss:$8 sps:$4 sm:$0xff]   ;;  %v1583_v15 = vld [vmem:[#allocation2 + $0x370] ss:$8 sps:$4 sm:$0xff]   ;;  %v1589_v19 = vld [vmem:[#allocation2 + $0x360] ss:$8 sps:$4 sm:$0xff]  }
  0x28   :  { %886 = vmatpush1.bf16.msra.mxu1 %v1525_v27  ;;  %844 = vmatprep.subr.bf16.mxu0 %v1526_v28  ;;  %v1594_v20 = vld [vmem:[#allocation2 + $0x254] ss:$8 sps:$4 sm:$0xff]   ;;  %v1592_v22 = vld [vmem:[#allocation2 + $0x250] ss:$8 sps:$4 sm:$0xff]   ;;  %v1600_v24 = vld [vmem:[#allocation2 + $0x244] ss:$8 sps:$4 sm:$0xff]  }
  0x29   :  { %887 = vmatprep.subr.bf16.mxu1 %v1528_v29  ;;  %v1597_v21 = vld [vmem:[#allocation2 + $0x354] ss:$8 sps:$4 sm:$0xff]   ;;  %v1595_v23 = vld [vmem:[#allocation2 + $0x350] ss:$8 sps:$4 sm:$0xff]   ;;  %v1603_v25 = vld [vmem:[#allocation2 + $0x344] ss:$8 sps:$4 sm:$0xff]  }
  0x2a   :  { %v1598_v26 = vld [vmem:[#allocation2 + $0x240] ss:$8 sps:$4 sm:$0xff]   ;;  %v1606_v28 = vld [vmem:[#allocation2 + $0x234] ss:$8 sps:$4 sm:$0xff]   ;;  %v1631_v53 = vld [vmem:[#allocation2 + $0x3f0] ss:$8 sps:$4 sm:$0xff]  }
  0x2b   :  { %845 = vmatpush1.bf16.msra.mxu0 %v1530_v30  ;;  %v1601_v27 = vld [vmem:[#allocation2 + $0x340] ss:$8 sps:$4 sm:$0xff]   ;;  %v1609_v29 = vld [vmem:[#allocation2 + $0x334] ss:$8 sps:$4 sm:$0xff]   ;;  %v1604_v30 = vld [vmem:[#allocation2 + $0x230] ss:$8 sps:$4 sm:$0xff]  }
  0x2c   :  { %888 = vmatpush1.bf16.msra.mxu1 %v1531_v31  ;;  %846 = vmatprep.subr.bf16.mxu0 %v1532_v32  ;;  %v1607_v31 = vld [vmem:[#allocation2 + $0x330] ss:$8 sps:$4 sm:$0xff]   ;;  %v1612_v32 = vld [vmem:[#allocation2 + $0x224] ss:$8 sps:$4 sm:$0xff]   ;;  %v1622_v47 = vld [vmem:[#allocation2 + $0x200] ss:$8 sps:$4 sm:$0xff]  }
  0x2d   :  { %889 = vmatprep.subr.bf16.mxu1 %v1534_v33  ;;  %v1615_v33 = vld [vmem:[#allocation2 + $0x324] ss:$8 sps:$4 sm:$0xff]   ;;  %v53_v46 = vld [vmem:[%s1891_s0 + $0x78] sm:$0xff]  ;;  %v1625_v48 = vld [vmem:[#allocation2 + $0x300] ss:$8 sps:$4 sm:$0xff]  }
  0x2e   :  { %v1636_v54 = vld [vmem:[#allocation2 + $0x2e4] ss:$8 sps:$4 sm:$0xff]   ;;  %v1658_v8 = vld [vmem:[#allocation2 + $0x2a0] ss:$8 sps:$4 sm:$0xff]  }
  0x2f   :  { %847 = vmatpush2.bf16.msra.mxu0 %v1536_v34  ;;  %v1610_v34 = vld [vmem:[#allocation2 + $0x220] ss:$8 sps:$4 sm:$0xff]   ;;  %v1660_v6 = vld [vmem:[#allocation2 + $0x2a4] ss:$8 sps:$4 sm:$0xff]  }
  0x30   :  { %890 = vmatpush2.bf16.msra.mxu1 %v1537_v35  ;;  %848 = vmatprep.subr.bf16.mxu0 %v1538_v36  ;;  %v1613_v35 = vld [vmem:[#allocation2 + $0x320] ss:$8 sps:$4 sm:$0xff]   ;;  %v1618_v36 = vld [vmem:[#allocation2 + $0x214] ss:$8 sps:$4 sm:$0xff]   ;;  %v1663_v7 = vld [vmem:[#allocation2 + $0x3a4] ss:$8 sps:$4 sm:$0xff]  }
  0x31   :  { %891 = vmatprep.subr.bf16.mxu1 %v1540_v37  ;;  %v1621_v37 = vld [vmem:[#allocation2 + $0x314] ss:$8 sps:$4 sm:$0xff]   ;;  %v1661_v9 = vld [vmem:[#allocation2 + $0x3a0] ss:$8 sps:$4 sm:$0xff]  }
  0x33   :  { %849 = vmatpush2.bf16.msra.mxu0 %v1542_v38  ;;  %v1616_v38 = vld [vmem:[#allocation2 + $0x210] ss:$8 sps:$4 sm:$0xff]  }
  0x34   :  { %892 = vmatpush2.bf16.msra.mxu1 %v1543_v39  ;;  %850 = vmatprep.subr.bf16.mxu0 %v1544_v40  ;;  %v1619_v39 = vld [vmem:[#allocation2 + $0x310] ss:$8 sps:$4 sm:$0xff]   ;;  %v43_v40 = vld [vmem:[%s1891_s0 + $0x28] sm:$0xff] }
  0x35   :  { %893 = vmatprep.subr.bf16.mxu1 %v1546_v41  ;;  %v51_v41 = vld [vmem:[%s1891_s0 + $0x68] sm:$0xff] }
  0x37   :  { %851 = vmatpush2.bf16.msra.mxu0 %v1548_v42  ;;  %v45_v42 = vld [vmem:[%s1891_s0 + $0x38] sm:$0xff] }
  0x38   :  { %894 = vmatpush2.bf16.msra.mxu1 %v1549_v43  ;;  %852 = vmatprep.subr.bf16.mxu0 %v1550_v44  ;;  %v1624_v43 = vld [vmem:[#allocation2 + $0x204] ss:$8 sps:$4 sm:$0xff]   ;;  %v61_v49 = vpack.c.bf16 %v53_v46, %v45_v42 }
  0x39   :  { %895 = vmatprep.subr.bf16.mxu1 %v1552_v45  ;;  %v1627_v44 = vld [vmem:[#allocation2 + $0x304] ss:$8 sps:$4 sm:$0xff]   ;;  %v59_v45 = vpack.c.bf16 %v51_v41, %v43_v40 }
  0x3b   :  { %853 = vmatpush2.bf16.msra.mxu0 %v1554_v50  ;;  %v1630_v50 = vld [vmem:[#allocation2 + $0x2f4] ss:$8 sps:$4 sm:$0xff]  }
  0x3c   :  { %896 = vmatpush2.bf16.msra.mxu1 %v1555_v51  ;;  %854 = vmatprep.subr.bf16.mxu0 %v1556_v52  ;;  %v1633_v51 = vld [vmem:[#allocation2 + $0x3f4] ss:$8 sps:$4 sm:$0xff]   ;;  %v1628_v52 = vld [vmem:[#allocation2 + $0x2f0] ss:$8 sps:$4 sm:$0xff]  }
  0x3d   :  { %897 = vmatprep.subr.bf16.mxu1 %v1558_v55  ;;  %v1639_v55 = vld [vmem:[#allocation2 + $0x3e4] ss:$8 sps:$4 sm:$0xff]  }
  0x3f   :  { %855 = vmatpush2.bf16.msra.mxu0 %v1560_v56  ;;  %v1634_v56 = vld [vmem:[#allocation2 + $0x2e0] ss:$8 sps:$4 sm:$0xff]  }
  0x40   :  { %898 = vmatpush2.bf16.msra.mxu1 %v1561_v57  ;;  %856 = vmatprep.subr.bf16.mxu0 %v1562_v58  ;;  %v1637_v57 = vld [vmem:[#allocation2 + $0x3e0] ss:$8 sps:$4 sm:$0xff]   ;;  %v1642_v58 = vld [vmem:[#allocation2 + $0x2d4] ss:$8 sps:$4 sm:$0xff]  }
  0x41   :  { %899 = vmatprep.subr.bf16.mxu1 %v1564_v59  ;;  %v1645_v59 = vld [vmem:[#allocation2 + $0x3d4] ss:$8 sps:$4 sm:$0xff]  }
  0x43   :  { %857 = vmatpush2.bf16.msra.mxu0 %v1566_v60  ;;  %v1640_v60 = vld [vmem:[#allocation2 + $0x2d0] ss:$8 sps:$4 sm:$0xff]  }
  0x44   :  { %900 = vmatpush2.bf16.msra.mxu1 %v1567_v61  ;;  %858 = vmatprep.subr.bf16.mxu0 %v1568_v62  ;;  %v1643_v61 = vld [vmem:[#allocation2 + $0x3d0] ss:$8 sps:$4 sm:$0xff]   ;;  %v1648_v62 = vld [vmem:[#allocation2 + $0x2c4] ss:$8 sps:$4 sm:$0xff]  }
  0x45   :  { %901 = vmatprep.subr.bf16.mxu1 %v1570_v63  ;;  %v1651_v63 = vld [vmem:[#allocation2 + $0x3c4] ss:$8 sps:$4 sm:$0xff]  }
  0x47   :  { %859 = vmatpush2.bf16.msra.mxu0 %v1572_v0  ;;  %v1646_v0 = vld [vmem:[#allocation2 + $0x2c0] ss:$8 sps:$4 sm:$0xff]  }
  0x48   :  { %902 = vmatpush2.bf16.msra.mxu1 %v1573_v1  ;;  %860 = vmatprep.subr.bf16.mxu0 %v1574_v2  ;;  %v1649_v1 = vld [vmem:[#allocation2 + $0x3c0] ss:$8 sps:$4 sm:$0xff]   ;;  %v1654_v2 = vld [vmem:[#allocation2 + $0x2b4] ss:$8 sps:$4 sm:$0xff]  }
  0x49   :  { %903 = vmatprep.subr.bf16.mxu1 %v1576_v3  ;;  %v1657_v3 = vld [vmem:[#allocation2 + $0x3b4] ss:$8 sps:$4 sm:$0xff]  }
  0x4b   :  { %861 = vmatpush2.bf16.msra.mxu0 %v1578_v4  ;;  %v1652_v4 = vld [vmem:[#allocation2 + $0x2b0] ss:$8 sps:$4 sm:$0xff]  }
  0x4c   :  { %904 = vmatpush2.bf16.msra.mxu1 %v1579_v5  ;;  %916 = vmatprep.subr.bf16.mxu0 %v1582_v10  ;;  %v1655_v5 = vld [vmem:[#allocation2 + $0x3b0] ss:$8 sps:$4 sm:$0xff]   ;;  %v1666_v10 = vld [vmem:[#allocation2 + $0x294] ss:$8 sps:$4 sm:$0xff]  }
  0x4d   :  { %959 = vmatprep.subr.bf16.mxu1 %v1585_v11  ;;  %v1669_v11 = vld [vmem:[#allocation2 + $0x394] ss:$8 sps:$4 sm:$0xff]  }
  0x4e   :  { %863 = vmatmul.mubr.bf16.vlgmr.msra.gmra.mxu0 %v54_v12  ;;  %v1664_v12 = vld [vmem:[#allocation2 + $0x290] ss:$8 sps:$4 sm:$0xff]  }
  0x4f   :  { %906 = vmatmul.mubr.bf16.vlgmr.msra.gmra.mxu1 %v56_v13  ;;  %917 = vmatpush1.bf16.msra.mxu0 %v1580_v14  ;;  %v1667_v13 = vld [vmem:[#allocation2 + $0x390] ss:$8 sps:$4 sm:$0xff]   ;;  %v1672_v14 = vld [vmem:[#allocation2 + $0x284] ss:$8 sps:$4 sm:$0xff]  }
  0x50   :  { %960 = vmatpush1.bf16.msra.mxu1 %v1583_v15  ;;  %918 = vmatprep.subr.bf16.mxu0 %v1588_v16  ;;  %v1675_v15 = vld [vmem:[#allocation2 + $0x384] ss:$8 sps:$4 sm:$0xff]   ;;  %v1670_v16 = vld [vmem:[#allocation2 + $0x280] ss:$8 sps:$4 sm:$0xff]  }
  0x51   :  { %961 = vmatprep.subr.bf16.mxu1 %v1591_v17  ;;  %948 = vmatprep.mubr.bf16.mxu0 %v59_v45  ;;  %v1673_v17 = vld [vmem:[#allocation2 + $0x380] ss:$8 sps:$4 sm:$0xff]  }
  0x52   :  { %991 = vmatprep.mubr.bf16.mxu1 %v61_v49 }
  0x53   :  { %919 = vmatpush1.bf16.msra.mxu0 %v1586_v18  ;;  %v42_v18 = vld [vmem:[%s1891_s0 + $0x20] sm:$0xff] }
  0x54   :  { %962 = vmatpush1.bf16.msra.mxu1 %v1589_v19  ;;  %920 = vmatprep.subr.bf16.mxu0 %v1594_v20  ;;  %v50_v19 = vld [vmem:[%s1891_s0 + $0x60] sm:$0xff]  ;;  %v44_v20 = vld [vmem:[%s1891_s0 + $0x30] sm:$0xff] }
  0x55   :  { %963 = vmatprep.subr.bf16.mxu1 %v1597_v21  ;;  %v52_v21 = vld [vmem:[%s1891_s0 + $0x70] sm:$0xff] }
  0x57   :  { %921 = vmatpush1.bf16.msra.mxu0 %v1592_v22  ;;  %v58_v22 = vpack.c.bf16 %v50_v19, %v42_v18 }
  0x58   :  { %964 = vmatpush1.bf16.msra.mxu1 %v1595_v23  ;;  %922 = vmatprep.subr.bf16.mxu0 %v1600_v24  ;;  %v60_v23 = vpack.c.bf16 %v52_v21, %v44_v20  ;;  %v1676_v24 = vld [vmem:[%s1895_s4 + $0x78] sm:$0xff]  }
  0x59   :  { %965 = vmatprep.subr.bf16.mxu1 %v1603_v25  ;;  %v1677_v25 = vld [vmem:[%s1895_s4 + $0x38] sm:$0xff]  }
  0x5b   :  { %923 = vmatpush1.bf16.msra.mxu0 %v1598_v26  ;;  %v1678_v26 = vld [vmem:[%s1895_s4 + $0x70] sm:$0xff]  }
  0x5c   :  { %966 = vmatpush1.bf16.msra.mxu1 %v1601_v27  ;;  %924 = vmatprep.subr.bf16.mxu0 %v1606_v28  ;;  %v1679_v27 = vld [vmem:[%s1895_s4 + $0x30] sm:$0xff]   ;;  %v1680_v28 = vld [vmem:[%s1895_s4 + $0x68] sm:$0xff]  }
  0x5d   :  { %967 = vmatprep.subr.bf16.mxu1 %v1609_v29  ;;  %v1681_v29 = vld [vmem:[%s1895_s4 + $0x28] sm:$0xff]  }
  0x5f   :  { %925 = vmatpush1.bf16.msra.mxu0 %v1604_v30  ;;  %v1682_v30 = vld [vmem:[%s1895_s4 + $0x60] sm:$0xff]  }
  0x60   :  { %968 = vmatpush1.bf16.msra.mxu1 %v1607_v31  ;;  %926 = vmatprep.subr.bf16.mxu0 %v1612_v32  ;;  %v1683_v31 = vld [vmem:[%s1895_s4 + $0x20] sm:$0xff]   ;;  %v1684_v32 = vld [vmem:[%s1895_s4 + $0x58] sm:$0xff]  }
  0x61   :  { %969 = vmatprep.subr.bf16.mxu1 %v1615_v33  ;;  %v1685_v33 = vld [vmem:[%s1895_s4 + $0x18] sm:$0xff]  }
  0x63   :  { %927 = vmatpush1.bf16.msra.mxu0 %v1610_v34  ;;  %v1686_v34 = vld [vmem:[%s1895_s4 + $0x50] sm:$0xff]  }
  0x64   :  { %970 = vmatpush1.bf16.msra.mxu1 %v1613_v35  ;;  %928 = vmatprep.subr.bf16.mxu0 %v1618_v36  ;;  %v1687_v35 = vld [vmem:[%s1895_s4 + $0x10] sm:$0xff]   ;;  %v1688_v36 = vld [vmem:[%s1895_s4 + $0x48] sm:$0xff]  }
  0x65   :  { %971 = vmatprep.subr.bf16.mxu1 %v1621_v37  ;;  %v1689_v37 = vld [vmem:[%s1895_s4 + $0x8] sm:$0xff]  }
  0x67   :  { %929 = vmatpush1.bf16.msra.mxu0 %v1616_v38  ;;  %v1690_v38 = vld [vmem:[%s1895_s4 + $0x40] sm:$0xff]  }
  0x68   :  { %972 = vmatpush1.bf16.msra.mxu1 %v1619_v39  ;;  %930 = vmatprep.subr.bf16.mxu0 %v1624_v43  ;;  %v1691_v39 = vld [vmem:[%s1895_s4] sm:$0xff]  }
  0x69   :  { %973 = vmatprep.subr.bf16.mxu1 %v1627_v44 }
  0x6b   :  { %931 = vmatpush1.bf16.msra.mxu0 %v1622_v47 }
  0x6c   :  { %974 = vmatpush1.bf16.msra.mxu1 %v1625_v48  ;;  %932 = vmatprep.subr.bf16.mxu0 %v1630_v50 }
  0x6d   :  { %975 = vmatprep.subr.bf16.mxu1 %v1633_v51 }
  0x6f   :  { %933 = vmatpush2.bf16.msra.mxu0 %v1628_v52 }
  0x70   :  { %976 = vmatpush2.bf16.msra.mxu1 %v1631_v53  ;;  %934 = vmatprep.subr.bf16.mxu0 %v1636_v54 }
  0x71   :  { %977 = vmatprep.subr.bf16.mxu1 %v1639_v55 }
  0x73   :  { %935 = vmatpush2.bf16.msra.mxu0 %v1634_v56 }
  0x74   :  { %978 = vmatpush2.bf16.msra.mxu1 %v1637_v57  ;;  %936 = vmatprep.subr.bf16.mxu0 %v1642_v58 }
  0x75   :  { %979 = vmatprep.subr.bf16.mxu1 %v1645_v59 }
  0x77   :  { %937 = vmatpush2.bf16.msra.mxu0 %v1640_v60 }
  0x78   :  { %980 = vmatpush2.bf16.msra.mxu1 %v1643_v61  ;;  %938 = vmatprep.subr.bf16.mxu0 %v1648_v62 }
  0x79   :  { %981 = vmatprep.subr.bf16.mxu1 %v1651_v63 }
  0x7b   :  { %939 = vmatpush2.bf16.msra.mxu0 %v1646_v0 }
  0x7c   :  { %982 = vmatpush2.bf16.msra.mxu1 %v1649_v1  ;;  %940 = vmatprep.subr.bf16.mxu0 %v1654_v2 }
  0x7d   :  { %983 = vmatprep.subr.bf16.mxu1 %v1657_v3 }
  0x7f   :  { %941 = vmatpush2.bf16.msra.mxu0 %v1652_v4 }
  0x80   :  { %984 = vmatpush2.bf16.msra.mxu1 %v1655_v5  ;;  %942 = vmatprep.subr.bf16.mxu0 %v1660_v6 }
  0x81   :  { %985 = vmatprep.subr.bf16.mxu1 %v1663_v7 }
  0x83   :  { %943 = vmatpush2.bf16.msra.mxu0 %v1658_v8 }
  0x84   :  { %986 = vmatpush2.bf16.msra.mxu1 %v1661_v9  ;;  %944 = vmatprep.subr.bf16.mxu0 %v1666_v10 }
  0x85   :  { %987 = vmatprep.subr.bf16.mxu1 %v1669_v11 }
  0x87   :  { %945 = vmatpush2.bf16.msra.mxu0 %v1664_v12 }
  0x88   :  { %988 = vmatpush2.bf16.msra.mxu1 %v1667_v13  ;;  %946 = vmatprep.subr.bf16.mxu0 %v1672_v14 }
  0x89   :  { %989 = vmatprep.subr.bf16.mxu1 %v1675_v15 }
  0x8b   :  { %947 = vmatpush2.bf16.msra.mxu0 %v1670_v16 }
  0x8c   :  { %990 = vmatpush2.bf16.msra.mxu1 %v1673_v17  ;;  %1458 = vmatprep.subr.bf16.mxu0 %v1676_v24 }
  0x8e   :  { %949 = vmatmul.mubr.bf16.vlgmr.msra.gmra.mxu0 %v58_v22 }
  0x8f   :  { %992 = vmatmul.mubr.bf16.vlgmr.msra.gmra.mxu1 %v60_v23  ;;  %1459 = vmatpush3.bf16.msra.mxu0 %v1677_v25 }
  0x90   :  { %1460 = vmatprep.subr.bf16.mxu0 %v1678_v26 }
  0x93   :  { %1461 = vmatpush3.bf16.msra.mxu0 %v1679_v27 }
  0x94   :  { %1462 = vmatprep.subr.bf16.mxu0 %v1680_v28 }
  0x97   :  { %1463 = vmatpush3.bf16.msra.mxu0 %v1681_v29 }
  0x98   :  { %1464 = vmatprep.subr.bf16.mxu0 %v1682_v30 }
  0x9b   :  { %1465 = vmatpush3.bf16.msra.mxu0 %v1683_v31 }
  0x9c   :  { %1466 = vmatprep.subr.bf16.mxu0 %v1684_v32 }
  0x9f   :  { %1467 = vmatpush3.bf16.msra.mxu0 %v1685_v33 }
  0xa0   :  { %1468 = vmatprep.subr.bf16.mxu0 %v1686_v34 }
  0xa3   :  { %1469 = vmatpush3.bf16.msra.mxu0 %v1687_v35 }
  0xa4   :  { %1470 = vmatprep.subr.bf16.mxu0 %v1688_v36 }
  0xa7   :  { %1471 = vmatpush3.bf16.msra.mxu0 %v1689_v37 }
  0xa8   :  { %1472 = vmatprep.subr.bf16.mxu0 %v1690_v38 }
  0xab   :  { %1473 = vmatpush3.bf16.msra.mxu0 %v1691_v39 }
 0x10e   :  { %v864_v40 = vpop.f32.mrf.mxu0 }
 0x10f   :  { %v907_v41 = vpop.f32.mrf.mxu1 }
 0x110   :  { %v866_v42 = vpop.f32.mrf.mxu0  ;;  %v908_v50 = vadd.f32 %v907_v41, %v864_v40 }
 0x111   :  { %v909_v43 = vpop.f32.mrf.mxu1 }
 0x112   :  { %v868_v44 = vpop.f32.mrf.mxu0  ;;  %v910_v53 = vadd.f32 %v909_v43, %v866_v42 }
 0x113   :  { %v911_v45 = vpop.f32.mrf.mxu1 }
 0x114   :  { %v870_v46 = vpop.f32.mrf.mxu0  ;;  %v912_v54 = vadd.f32 %v911_v45, %v868_v44 }
 0x115   :  { %v913_v47 = vpop.f32.mrf.mxu1 }
 0x116   :  { %v914_v58 = vadd.f32 %v913_v47, %v870_v46  ;;  %v1721_v46 = vmov 1966171168  }
 0x117   :  { %v1052_v47 = vunpack.c.l.s4 %v1721_v46 }
 0x14e   :  { %v950_v48 = vpop.f32.mrf.mxu0 }
 0x14f   :  { %v993_v49 = vpop.f32.mrf.mxu1  ;;  %v951_v55 = vadd.f32 %v950_v48, %v908_v50  ;;  %v1054_v48 = vlaneseq }
 0x150   :  { %v952_v51 = vpop.f32.mrf.mxu0 }
 0x151   :  { %v995_v52 = vpop.f32.mrf.mxu1  ;;  %v953_v59 = vadd.f32 %v952_v51, %v910_v53  ;;  %v1856_v62 = vadd.f32 %v993_v49, %v951_v55  ;;  %v1053_v49 = vunpack.c.0.s8 %v1052_v47  ;;  %v1055_v50 = vshrl.u32 %v1054_v48, 7 }
 0x152   :  { %v954_v56 = vpop.f32.mrf.mxu0 }
 0x153   :  { %v997_v57 = vpop.f32.mrf.mxu1  ;;  %v955_v60 = vadd.f32 %v954_v56, %v912_v54  ;;  %v1860_v2 = vadd.f32 %v995_v52, %v953_v59  ;;  %v1056_v52 = vsub.s32 %v1053_v49, %v1055_v50  ;;  %v1043_v56 = vld [vmem:[%s1893_s2] sm:$0x3]  ;;  %v1075_v59 = vsub.s32 1, %v1055_v50 }
 0x154   :  { %v956_v61 = vpop.f32.mrf.mxu0 }
 0x155   :  { %v1858_v63 = vadd.f32 %v997_v57, %v955_v60  ;;  %v957_v0 = vadd.f32 %v956_v61, %v914_v58  ;;  %v999_v1 = vpop.f32.mrf.mxu1  ;;  %v1071_v58 = vsub.s32 0, %v1055_v50 }
 0x157   :  { %v1002_v3 = vadd.f32 %v1858_v63, %v1856_v62  ;;  %v1864_v4 = vadd.f32 %v999_v1, %v957_v0 }
 0x159   :  { %v1003_v5 = vrot.slane %v1002_v3, 4  ;;  %v1009_v6 = vadd.f32 %v1864_v4, %v1860_v2 }
 0x15b   :  { %v1004_v7 = vadd.f32 %v1003_v5, %v1002_v3  ;;  %v1010_v8 = vrot.slane %v1009_v6, 4 }
 0x15d   :  { %v1005_v9 = vrot.slane %v1004_v7, 2  ;;  %v1011_v10 = vadd.f32 %v1010_v8, %v1009_v6 }
 0x15f   :  { %v1006_v11 = vadd.f32 %v1005_v9, %v1004_v7  ;;  %v1012_v12 = vrot.slane %v1011_v10, 2  ;;  %v1067_v7 = vld [vmem:[%s1894_s3] sm:$0x3] }
 0x161   :  { %v1007_v13 = vrot.slane %v1006_v11, 1  ;;  %v1013_v14 = vadd.f32 %v1012_v12, %v1011_v10 }
 0x163   :  { %v1008_v15 = vadd.f32 %v1007_v13, %v1006_v11  ;;  %v1014_v16 = vrot.slane %v1013_v14, 1 }
 0x165   :  { %v1017_v17 = vmul.f32 0.0625, %v1008_v15  ;;  %v1015_v18 = vadd.f32 %v1014_v16, %v1013_v14 }
 0x167   :  { %v1019_v19 = vsub.f32 %v1856_v62, %v1017_v17  ;;  %v1021_v20 = vsub.f32 %v1858_v63, %v1017_v17  ;;  %v1018_v21 = vmul.f32 0.0625, %v1015_v18 }
 0x169   :  { %v1023_v22 = vmul.f32 %v1019_v19, %v1019_v19  ;;  %v1025_v23 = vmul.f32 %v1021_v20, %v1021_v20  ;;  %v1020_v24 = vsub.f32 %v1860_v2, %v1018_v21  ;;  %v1022_v25 = vsub.f32 %v1864_v4, %v1018_v21 }
 0x16b   :  { %v1027_v26 = vadd.f32 %v1025_v23, %v1023_v22  ;;  %v1024_v27 = vmul.f32 %v1020_v24, %v1020_v24  ;;  %v1026_v28 = vmul.f32 %v1022_v25, %v1022_v25 }
 0x16d   :  { %v1028_v29 = vrot.slane %v1027_v26, 4  ;;  %v1034_v30 = vadd.f32 %v1026_v28, %v1024_v27 }
 0x16f   :  { %v1029_v31 = vadd.f32 %v1028_v29, %v1027_v26  ;;  %v1035_v32 = vrot.slane %v1034_v30, 4 }
 0x171   :  { %v1030_v33 = vrot.slane %v1029_v31, 2  ;;  %v1036_v34 = vadd.f32 %v1035_v32, %v1034_v30 }
 0x173   :  { %v1031_v35 = vadd.f32 %v1030_v33, %v1029_v31  ;;  %v1037_v36 = vrot.slane %v1036_v34, 2 }
 0x175   :  { %v1032_v37 = vrot.slane %v1031_v35, 1  ;;  %v1038_v38 = vadd.f32 %v1037_v36, %v1036_v34 }
 0x177   :  { %v1033_v39 = vadd.f32 %v1032_v37, %v1031_v35  ;;  %v1039_v40 = vrot.slane %v1038_v38, 1 }
 0x179   :  { %v1041_v41 = vmul.f32 0.0625, %v1033_v39  ;;  %v1040_v42 = vadd.f32 %v1039_v40, %v1038_v38 }
 0x17b   :  { %v1044_v43 = vadd.f32 1e-05, %v1041_v41  ;;  %v1042_v44 = vmul.f32 0.0625, %v1040_v42 }
 0x17d   :  { %v1045_v45 = vadd.f32 1e-05, %v1042_v44  ;;  %1692 = vrsqrt.f32 %v1044_v43 }
 0x17f   :  { %1694 = vrsqrt.f32 %v1045_v45 }
 0x18a   :  { %v1693_v51 = vpop.eup %1692 }
 0x18c   :  { %v1695_v53 = vpop.eup %1694 }
 0x18d   :  { %v1050_v54 = vcombine.low %v1693_v51, %v1695_v53 }
 0x18f   :  { %v1057_v55 = vrot.slane %v1050_v54, %v1056_v52 }
 0x191   :  { %v1064_v57 = vrot.slane %v1057_v55, %v1056_v52 }
 0x193   :  { %v1066_v60 = vmul.f32 %v1064_v57, %v1043_v56 }
 0x195   :  { %v1072_v61 = vrot.slane %v1066_v60, %v1071_v58  ;;  %v1076_v0 = vrot.slane %v1066_v60, %v1075_v59 }
 0x197   :  { %v1079_v1 = vmul.f32 %v1072_v61, %v1017_v17  ;;  %v1080_v3 = vmul.f32 %v1076_v0, %v1018_v21  ;;  %v1103_v10 = vmul.f32 %v1076_v0, %v1864_v4  ;;  %v1101_v11 = vmul.f32 %v1076_v0, %v1860_v2 }
 0x198   :  { %v1100_v14 = vmul.f32 %v1072_v61, %v1856_v62  ;;  %v1102_v15 = vmul.f32 %v1072_v61, %v1858_v63  ;;  %v1441_v62 = vld [vmem:[%s1896_s5] ss:$0 sm:$0xff] }
 0x199   :  { %v1083_v5 = vcombine.low %v1079_v1, %v1080_v3 }
 0x19b   :  { %v1090_v6 = vrot.slane %v1083_v5, %v1056_v52 }
 0x19d   :  { %v1097_v8 = vrot.slane %v1090_v6, %v1056_v52 }
 0x19f   :  { %v1099_v9 = vsub.f32 %v1067_v7, %v1097_v8 }
 0x1a1   :  { %v1108_v12 = vrot.slane %v1099_v9, %v1071_v58  ;;  %v1112_v13 = vrot.slane %v1099_v9, %v1075_v59 }
 0x1a3   :  { %v1118_v16 = vadd.f32 %v1112_v13, %v1103_v10  ;;  %v1116_v17 = vadd.f32 %v1112_v13, %v1101_v11  ;;  %v1115_v18 = vadd.f32 %v1108_v12, %v1100_v14  ;;  %v1117_v19 = vadd.f32 %v1108_v12, %v1102_v15 }
 0x1a5   :  { %v1120_v20 = vmul.f32 0.01, %v1116_v17  ;;  %v1122_v21 = vmul.f32 0.01, %v1118_v16  ;;  %v1119_v22 = vmul.f32 0.01, %v1115_v18 }
 0x1a6   :  { %v1121_v23 = vmul.f32 0.01, %v1117_v19 }
 0x1a7   :  { %v1124_v24 = vmax.f32 %v1116_v17, %v1120_v20  ;;  %v1126_v25 = vmax.f32 %v1118_v16, %v1122_v21  ;;  %v1123_v26 = vmax.f32 %v1115_v18, %v1119_v22 }
 0x1a8   :  { %v1125_v4 = vmax.f32 %v1117_v19, %v1121_v23 }
 0x1a9   :  { %v1128_v27 = vpack.c.bf16 %v1126_v25, %v1124_v24 }
 0x1aa   :  { %v1127_v2 = vpack.c.bf16 %v1125_v4, %v1123_v26 }
 0x1ab   :  { %1296 = vmatprep.mubr.bf16.mxu0 %v1128_v27 }
 0x1ac   :  { %1297 = vmatmul.mubr.bf16.vlgmr.msra.gmra.mxu0 %v1127_v2 }
 0x26c   :  { %v1474_v28 = vpop.f32.mrf.mxu0 }
 0x26e   :  { %v1475_v63 = vpop.f32.mrf.mxu0 }
 0x26f   :  { %v1476_v29 = vadd.f32 %v1475_v63, %v1474_v28 }
 0x270   :  { %v1477_v30 = vpop.f32.mrf.mxu0 }
 0x271   :  { %v1299_v31 = vadd.f32 %v1476_v29, %v1441_v62 }
 0x272   :  { %v1478_v32 = vpop.f32.mrf.mxu0 }
 0x273   :  { %1306 = vst.msk [vmem:[%s1897_s6] sm:$0xff] %vm1305_vm0, %v1299_v31  ;;  %v1479_v33 = vadd.f32 %v1478_v32, %v1477_v30 }
 0x275   :  { %v1302_v34 = vadd.f32 %v1479_v33, %v1441_v62 }
 0x277   :  { %1307 = vst.msk [vmem:[%s1897_s6 + $0x8] sm:$0xff] %vm1305_vm0, %v1302_v34 }
 0x278   :  { %1312 = vsyncpa [#allocation3], 1 }

</bundles_post_ra>
